<compile_context>
chip_gen: v6e
topology: v6e:2x2x1
jax: 0.10.0
libtpu: 0.0.40
codegen_flags: <defaults>
</compile_context>

<pallas_src>
import functools

import jax
import jax.numpy as jnp
from jax.experimental import pallas as pl
from jax.experimental.pallas import tpu as pltpu


# ----------------------------------------------------------------------------
# helpers
# ----------------------------------------------------------------------------

def _cp(c):
    """Pad channel count up to a multiple of 128 (TPU lane width)."""
    return ((c + 127) // 128) * 128


def _pick_tile(m, pref=128):
    """Largest row tile <= pref that divides m and is a multiple of 8; else full m."""
    for t in (pref, 128, 64, 32, 16, 8):
        if t <= pref and m >= t and m % t == 0:
            return t
    return m


# ----------------------------------------------------------------------------
# Pallas kernels
# ----------------------------------------------------------------------------

def _matmul_bias_act_kernel(a_ref, b_ref, bias_ref, o_ref, *, act):
    acc = jnp.dot(a_ref[...], b_ref[...], preferred_element_type=jnp.float32)
    acc = acc + bias_ref[...]
    if act == "silu":
        acc = acc * jax.nn.sigmoid(acc)
    elif act == "relu":
        acc = jnp.maximum(acc, 0.0)
    elif act == "sigmoid":
        acc = jax.nn.sigmoid(acc)
    o_ref[...] = acc


def matmul_bias_act(a, b, bias, act="none"):
    """(M,K) @ (K,N) + bias with fused activation.

    N is pre-padded to a multiple of 128 at init time; grid tiles both M and N.
    """
    m, k = a.shape
    n = b.shape[1]
    tm = _pick_tile(m, 128)
    tn = 256 if n % 256 == 0 else 128
    return pl.pallas_call(
        functools.partial(_matmul_bias_act_kernel, act=act),
        out_shape=jax.ShapeDtypeStruct((m, n), jnp.float32),
        grid=(m // tm, n // tn),
        in_specs=[
            pl.BlockSpec((tm, k), lambda i, j: (i, 0)),
            pl.BlockSpec((k, tn), lambda i, j: (0, j)),
            pl.BlockSpec((1, tn), lambda i, j: (0, j)),
        ],
        out_specs=pl.BlockSpec((tm, tn), lambda i, j: (i, j)),
        compiler_params=pltpu.CompilerParams(
            dimension_semantics=("parallel", "parallel")),
    )(a, b, bias)


def _dwconv_kernel(*refs, k, stride, ho, wo):
    """Depthwise conv with strided output computed directly.

    refs = (plane_0 [, plane_1, plane_2, plane_3], w, b, out).
    For stride 2 the wrapper passes 4 parity planes of the padded input so every
    tap is a contiguous (unstrided) slice; for stride 1 a single plane.
    """
    nplanes = 1 if stride == 1 else 4
    w_ref = refs[nplanes]
    b_ref = refs[nplanes + 1]
    o_ref = refs[nplanes + 2]
    w_all = w_ref[...]                                    # hoisted tap table (k*k, tc)
    acc = jnp.zeros(o_ref.shape, jnp.float32)
    for kh in range(k):
        for kw in range(k):
            if stride == 1:
                pi, oh, ow = 0, kh, kw
            else:
                pi, oh, ow = (kh % 2) * 2 + (kw % 2), kh // 2, kw // 2
            tap = w_all[kh * k + kw:kh * k + kw + 1, :]   # (1, tc)
            acc = acc + refs[pi][:, oh:oh + ho, ow:ow + wo, :] * tap
    acc = acc + b_ref[...]                                # folded-BN bias
    o_ref[...] = acc * jax.nn.sigmoid(acc)                # SiLU


def depthwise_conv_bn_silu(x, w, b, k, stride):
    """Depthwise kxk conv (padding=(k-1)//2, stride in {1,2}) + folded-BN bias + SiLU."""
    n, h, wd, c = x.shape
    p = (k - 1) // 2
    ho = (h + 2 * p - k) // stride + 1
    wo = (wd + 2 * p - k) // stride + 1
    xp = jnp.pad(x, ((0, 0), (p, p), (p, p), (0, 0)))
    if stride == 1:
        planes = [xp]
    else:  # stride == 2 -> 4 parity planes, each exactly the extent the taps need
        need_h = (k - 1) // 2 + ho
        need_w = (k - 1) // 2 + wo
        planes = []
        for pa in range(2):
            for pb in range(2):
                pp = xp[:, pa::2, pb::2, :]
                pp = jnp.pad(pp, ((0, 0),
                                  (0, max(0, need_h - pp.shape[1])),
                                  (0, max(0, need_w - pp.shape[2])),
                                  (0, 0)))[:, :need_h, :need_w, :]
                planes.append(pp)
    hp2, wp2 = planes[0].shape[1], planes[0].shape[2]
    tc = 256 if c % 256 == 0 else 128
    plane_spec = pl.BlockSpec((1, hp2, wp2, tc), lambda i, j: (i, 0, 0, j))
    in_specs = [plane_spec] * len(planes) + [
        pl.BlockSpec((k * k, tc), lambda i, j: (0, j)),
        pl.BlockSpec((1, tc), lambda i, j: (0, j)),
    ]
    return pl.pallas_call(
        functools.partial(_dwconv_kernel, k=k, stride=stride, ho=ho, wo=wo),
        out_shape=jax.ShapeDtypeStruct((n, ho, wo, c), jnp.float32),
        grid=(n, c // tc),
        in_specs=in_specs,
        out_specs=pl.BlockSpec((1, ho, wo, tc), lambda i, j: (i, 0, 0, j)),
        compiler_params=pltpu.CompilerParams(
            dimension_semantics=("parallel", "parallel")),
    )(*planes, w, b)


def _gap_kernel(x_ref, o_ref):
    o_ref[...] = jnp.mean(x_ref[...], axis=1)


def global_avg_pool(x):
    """(N, H, W, C) -> (N, C); tiled over the channel axis."""
    n, h, w, c = x.shape
    hw = h * w
    xr = x.reshape(n, hw, c)
    tc = 256 if c % 256 == 0 else 128
    return pl.pallas_call(
        _gap_kernel,
        out_shape=jax.ShapeDtypeStruct((n, c), jnp.float32),
        grid=(c // tc,),
        in_specs=[pl.BlockSpec((n, hw, tc), lambda j: (0, 0, j))],
        out_specs=pl.BlockSpec((n, tc), lambda j: (0, j)),
        compiler_params=pltpu.CompilerParams(dimension_semantics=("parallel",)),
    )(xr)


def _proj_kernel(x_ref, g_ref, w_ref, b_ref, o_ref):
    a = x_ref[0] * g_ref[0]                                # fused SE channel-scale
    acc = jnp.dot(a, w_ref[...], preferred_element_type=jnp.float32)
    o_ref[0] = acc + b_ref[...]


def _proj_res_kernel(x_ref, g_ref, w_ref, b_ref, r_ref, o_ref):
    a = x_ref[0] * g_ref[0]                                # fused SE channel-scale
    acc = jnp.dot(a, w_ref[...], preferred_element_type=jnp.float32)
    o_ref[0] = acc + b_ref[...] + r_ref[0]                 # fused residual add


def proj_fused(x, gate, w, b, residual=None):
    """SE scale * x -> 1x1 conv (folded BN) -> (+ residual), all in one kernel."""
    n, h, wd, cexp = x.shape
    cout = w.shape[1]
    hw = h * wd
    thw = _pick_tile(hw, 128)
    tn = 256 if cout % 256 == 0 else 128
    xr = x.reshape(n, hw, cexp)
    g = gate.reshape(n, 1, cexp)
    in_specs = [
        pl.BlockSpec((1, thw, cexp), lambda i, m, j: (i, m, 0)),
        pl.BlockSpec((1, 1, cexp), lambda i, m, j: (i, 0, 0)),
        pl.BlockSpec((cexp, tn), lambda i, m, j: (0, j)),
        pl.BlockSpec((1, tn), lambda i, m, j: (0, j)),
    ]
    args = [xr, g, w, b]
    if residual is not None:
        in_specs.append(pl.BlockSpec((1, thw, tn), lambda i, m, j: (i, m, j)))
        args.append(residual.reshape(n, hw, cout))
        kern = _proj_res_kernel
    else:
        kern = _proj_kernel
    out = pl.pallas_call(
        kern,
        out_shape=jax.ShapeDtypeStruct((n, hw, cout), jnp.float32),
        grid=(n, hw // thw, cout // tn),
        in_specs=in_specs,
        out_specs=pl.BlockSpec((1, thw, tn), lambda i, m, j: (i, m, j)),
        compiler_params=pltpu.CompilerParams(
            dimension_semantics=("parallel", "parallel", "parallel")),
    )(*args)
    return out.reshape(n, h, wd, cout)


# ----------------------------------------------------------------------------
# Conv wrappers built on the Pallas matmul kernel
# ----------------------------------------------------------------------------

def conv2d_bn_act_im2col(x, w, b, k, stride, act):
    """Regular kxk conv (pad=(k-1)//2) as im2col + Pallas matmul (stem only)."""
    # TODO(synk): im2col patches are materialized via XLA slices/concat; could be
    # fused into the matmul index maps at real resolutions.
    n, h, wd, cin = x.shape
    p = (k - 1) // 2
    xp = jnp.pad(x, ((0, 0), (p, p), (p, p), (0, 0)))
    ho = (h + 2 * p - k) // stride + 1
    wo = (wd + 2 * p - k) // stride + 1
    cols = []
    for kh in range(k):
        for kw in range(k):
            cols.append(xp[:, kh:kh + ho * stride:stride, kw:kw + wo * stride:stride, :])
    patches = jnp.concatenate(cols, axis=-1)               # (N, Ho, Wo, k*k*Cin)
    a = patches.reshape(n * ho * wo, k * k * cin)
    kk = w.shape[0]                                        # K pre-padded (27 -> 32)
    if a.shape[1] < kk:
        a = jnp.pad(a, ((0, 0), (0, kk - a.shape[1])))
    out = matmul_bias_act(a, w, b, act)
    return out.reshape(n, ho, wo, w.shape[1])


def conv1x1_bn_act(x, w, b, act):
    n, h, wd, cin = x.shape
    out = matmul_bias_act(x.reshape(n * h * wd, cin), w, b, act)
    return out.reshape(n, h, wd, w.shape[1])


# ----------------------------------------------------------------------------
# Parameters (deterministic synthetic init; BN folded; channels padded to 128)
# ----------------------------------------------------------------------------

B0_CONFIG = [
    # (expand_ratio, kernel, stride, in_ch, out_ch, num_layers)
    (1, 3, 1, 32, 16, 1),
    (6, 3, 2, 16, 24, 2),
    (6, 5, 2, 24, 40, 2),
    (6, 3, 2, 40, 80, 3),
    (6, 5, 1, 80, 112, 3),
    (6, 5, 2, 112, 192, 4),
    (6, 3, 1, 192, 320, 1),
]


class KeyGen:
    def __init__(self, key):
        self.key = key

    def __call__(self):
        self.key, sub = jax.random.split(self.key)
        return sub


def fold_bn(key, cout, eps=1e-5):
    k1, k2, k3, k4 = jax.random.split(key, 4)
    gamma = 1.0 + 0.1 * jax.random.normal(k1, (cout,))
    beta = 0.1 * jax.random.normal(k2, (cout,))
    mean = 0.1 * jax.random.normal(k3, (cout,))
    var = 1.0 + 0.1 * jax.random.uniform(k4, (cout,))
    scale = gamma / jnp.sqrt(var + eps)
    bias = beta - mean * scale
    return scale, bias


def _pad_mat(w, k_to, n_to):
    return jnp.pad(w, ((0, k_to - w.shape[0]), (0, n_to - w.shape[1])))


def _pad_bias(b, n_to):
    return jnp.pad(b, (0, n_to - b.shape[0])).reshape(1, n_to)


def init_params(nclass, key):
    kg = KeyGen(key)
    params = {"nclass": nclass}

    # Stem: Conv3x3 s2 (3 -> 32) + BN (folded) + SiLU. K padded 27->32, N 32->128.
    w = 0.1 * jax.random.normal(kg(), (3 * 3 * 3, 32))
    s, b = fold_bn(kg(), 32)
    params["stem"] = {"w": _pad_mat(w * s[None, :], 32, _cp(32)),
                      "b": _pad_bias(b, _cp(32))}

    blocks = []
    for (er, k, stride, cin, cout, nl) in B0_CONFIG:
        for layer in range(nl):
            in_c = cin if layer == 0 else cout
            st = stride if layer == 0 else 1
            exp_c = in_c * er
            sq_c = max(1, in_c // 4)
            in_cp, out_cp, exp_cp, sq_cp = _cp(in_c), _cp(cout), _cp(exp_c), _cp(sq_c)
            blk = {"er": er, "k": k, "stride": st,
                   "in_c": in_c, "out_c": cout}
            if er != 1:
                w = 0.1 * jax.random.normal(kg(), (in_c, exp_c))
                s, b = fold_bn(kg(), exp_c)
                blk["expand_w"] = _pad_mat(w * s[None, :], in_cp, exp_cp)
                blk["expand_b"] = _pad_bias(b, exp_cp)
            w = 0.1 * jax.random.normal(kg(), (k * k, exp_c))
            s, b = fold_bn(kg(), exp_c)
            blk["dw_w"] = jnp.pad(w * s[None, :], ((0, 0), (0, exp_cp - exp_c)))
            blk["dw_b"] = _pad_bias(b, exp_cp)
            blk["se_w1"] = _pad_mat(0.1 * jax.random.normal(kg(), (exp_c, sq_c)), exp_cp, sq_cp)
            blk["se_b1"] = _pad_bias(0.01 * jax.random.normal(kg(), (sq_c,)), sq_cp)
            blk["se_w2"] = _pad_mat(0.1 * jax.random.normal(kg(), (sq_c, exp_c)), sq_cp, exp_cp)
            blk["se_b2"] = _pad_bias(0.01 * jax.random.normal(kg(), (exp_c,)), exp_cp)
            w = 0.1 * jax.random.normal(kg(), (exp_c, cout))
            s, b = fold_bn(kg(), cout)
            blk["proj_w"] = _pad_mat(w * s[None, :], exp_cp, out_cp)
            blk["proj_b"] = _pad_bias(b, out_cp)
            blocks.append(blk)
    params["blocks"] = blocks

    # Head: Conv1x1 (320 -> 1280) + BN (folded) + SiLU
    w = 0.1 * jax.random.normal(kg(), (320, 1280))
    s, b = fold_bn(kg(), 1280)
    params["head"] = {"w": _pad_mat(w * s[None, :], _cp(320), 1280),
                      "b": _pad_bias(b, 1280)}

    # Replaced classifier: Linear(1280,512) -> ReLU -> Dropout(0.5) -> Linear(512,nclass)
    params["fc1_w"] = 0.05 * jax.random.normal(kg(), (1280, 512))
    params["fc1_b"] = _pad_bias(0.01 * jax.random.normal(kg(), (512,)), 512)
    params["fc2_w"] = _pad_mat(0.05 * jax.random.normal(kg(), (512, nclass)), 512, _cp(nclass))
    params["fc2_b"] = _pad_bias(0.01 * jax.random.normal(kg(), (nclass,)), _cp(nclass))
    return params


# ----------------------------------------------------------------------------
# Forward pass
# ----------------------------------------------------------------------------

def mbconv_block(x, blk):
    inp = x
    if blk["er"] != 1:
        x = conv1x1_bn_act(x, blk["expand_w"], blk["expand_b"], "silu")
    x = depthwise_conv_bn_silu(x, blk["dw_w"], blk["dw_b"], blk["k"], blk["stride"])
    # Squeeze-and-Excitation gates
    pooled = global_avg_pool(x)                                     # (N, exp_c_p)
    se = matmul_bias_act(pooled, blk["se_w1"], blk["se_b1"], "silu")
    gate = matmul_bias_act(se, blk["se_w2"], blk["se_b2"], "sigmoid")
    # Fused: SE scale -> projection 1x1 (folded BN, no act) -> residual add.
    use_res = blk["stride"] == 1 and blk["in_c"] == blk["out_c"]
    # TODO(synk): stochastic depth is identity in eval mode; plain residual add.
    return proj_fused(x, gate, blk["proj_w"], blk["proj_b"],
                      inp if use_res else None)


def modified_efficientnet_b0_forward(params, x_nchw):
    # PyTorch NCHW input -> NHWC (channels -> 128-lane axis) once at the boundary.
    x = jnp.transpose(x_nchw, (0, 2, 3, 1)).astype(jnp.float32)
    x = conv2d_bn_act_im2col(x, params["stem"]["w"], params["stem"]["b"], 3, 2, "silu")
    for blk in params["blocks"]:
        x = mbconv_block(x, blk)
    x = conv1x1_bn_act(x, params["head"]["w"], params["head"]["b"], "silu")
    feat = global_avg_pool(x)                                       # (N, 1280)
    h = matmul_bias_act(feat, params["fc1_w"], params["fc1_b"], "relu")
    # TODO(synk): Dropout(0.5) is identity in eval mode; not applied.
    logits = matmul_bias_act(h, params["fc2_w"], params["fc2_b"], "none")
    return logits[:, :params["nclass"]]


if __name__ == "__main__":
    nclass = 10
    key = jax.random.PRNGKey(0)
    kp, kx = jax.random.split(key)
    params = init_params(nclass, kp)
    # NCHW like PyTorch, batch=2, 3 channels, 32x32 spatial (reduced /32 -> 1x1).
    x = jax.random.normal(kx, (2, 3, 32, 32), dtype=jnp.float32)
    logits = modified_efficientnet_b0_forward(params, x)
    logits = jax.block_until_ready(logits)
    assert logits.shape == (2, nclass), logits.shape
    assert bool(jnp.all(jnp.isfinite(logits)))
    print("KERNEL_OK")
</pallas_src>

<mosaic_0001>
module attributes {stable_mosaic.version = 11 : i64} {
  func.func @_matmul_bias_act_kernel(%arg0: i32, %arg1: i32, %arg2: memref<128x32xf32, #tpu.memory_space<vmem>>, %arg3: memref<32x128xf32, #tpu.memory_space<vmem>>, %arg4: memref<1x128xf32, #tpu.memory_space<vmem>>, %arg5: memref<128x128xf32, #tpu.memory_space<vmem>>) attributes {dimension_semantics = [#tpu.dimension_semantics<parallel>, #tpu.dimension_semantics<parallel>], iteration_bounds = array<i64: 4, 1>, scalar_prefetch = 0 : i64, scratch_operands = 0 : i64, tpu.core_type = #tpu.core_type<tc>, window_params = [{transform_indices = @transform_0, window_bounds = array<i64: 128, 32>}, {transform_indices = @transform_1, window_bounds = array<i64: 32, 128>}, {transform_indices = @transform_2, window_bounds = array<i64: 1, 128>}, {transform_indices = @transform_3, window_bounds = array<i64: 128, 128>}]} {
    %c0 = arith.constant 0 : index
    %c0_0 = arith.constant 0 : index
    %0 = vector.load %arg2[%c0, %c0_0] : memref<128x32xf32, #tpu.memory_space<vmem>>, vector<128x32xf32>
    %c0_1 = arith.constant 0 : index
    %c0_2 = arith.constant 0 : index
    %1 = vector.load %arg3[%c0_1, %c0_2] : memref<32x128xf32, #tpu.memory_space<vmem>>, vector<32x128xf32>
    %cst = arith.constant dense<0.000000e+00> : vector<128x128xf32>
    %2 = tpu.matmul %0, %1, %cst {dimension_numbers = #tpu.dot_dimension_numbers<[1], [0], [0], [1], [0, 0, 1, 1], [], []>} : vector<128x32xf32>, vector<32x128xf32>, vector<128x128xf32> -> vector<128x128xf32>
    %c0_3 = arith.constant 0 : index
    %c0_4 = arith.constant 0 : index
    %3 = vector.load %arg4[%c0_3, %c0_4] : memref<1x128xf32, #tpu.memory_space<vmem>>, vector<1x128xf32>
    %4 = vector.broadcast %3 : vector<1x128xf32> to vector<128x128xf32>
    %5 = arith.addf %2, %4 : vector<128x128xf32>
    %6 = arith.negf %5 : vector<128x128xf32>
    %7 = math.exp %6 : vector<128x128xf32>
    %cst_5 = arith.constant 1.000000e+00 : f32
    %8 = vector.broadcast %cst_5 : f32 to vector<128x128xf32>
    %9 = arith.addf %8, %7 : vector<128x128xf32>
    %10 = arith.divf %8, %9 : vector<128x128xf32>
    %11 = arith.mulf %5, %10 : vector<128x128xf32>
    %c0_6 = arith.constant 0 : index
    %c0_7 = arith.constant 0 : index
    %12 = vector.load %arg5[%c0_6, %c0_7] : memref<128x128xf32, #tpu.memory_space<vmem>>, vector<128x128xf32>
    tpu.vector_store %arg5[%c0_6, %c0_7], %11 {strides = array<i32>} : memref<128x128xf32, #tpu.memory_space<vmem>>, vector<128x128xf32>,
    return
  }
  func.func @transform_0(%arg0: i32, %arg1: i32) -> (i32, i32) {
    %c0_i32 = arith.constant 0 : i32
    %c0_i32_0 = arith.constant 0 : i32
    return %arg0, %c0_i32 : i32, i32
  }
  func.func @transform_1(%arg0: i32, %arg1: i32) -> (i32, i32) {
    %c0_i32 = arith.constant 0 : i32
    %c0_i32_0 = arith.constant 0 : i32
    return %c0_i32, %arg1 : i32, i32
  }
  func.func @transform_2(%arg0: i32, %arg1: i32) -> (i32, i32) {
    %c0_i32 = arith.constant 0 : i32
    %c0_i32_0 = arith.constant 0 : i32
    return %c0_i32, %arg1 : i32, i32
  }
  func.func @transform_3(%arg0: i32, %arg1: i32) -> (i32, i32) {
    %c0_i32 = arith.constant 0 : i32
    return %arg0, %arg1 : i32, i32
  }
}

</mosaic_0001>

<bundles_post_ra>
// kernel: tpu_custom_call.1
= control target key start
LH: loop header
LB: loop body
LE: loop exit
PB: predicated region body
PF: predicated region fallthrough
CT: control target
= control target key end

     0   :  { %8 = vsyncpa [#allocation3], 0  ;;  %s1260_s0 = inlined_call_operand.vmem [shape: f32[512,32], index: 0, kind: input, shape index: {}]   ;;  %s1261_s1 = inlined_call_operand.vmem [shape: f32[32,128], index: 1, kind: input, shape index: {}]   ;;  %s1262_s2 = inlined_call_operand.vmem [shape: f32[1,128], index: 2, kind: input, shape index: {}]   ;;  %s1263_s3 = inlined_call_operand.hbm [shape: f32[512,128], index: 3, kind: output, shape index: {}]  }
   0x1   :  { %10 = vsyncpa [#allocation3 + $0x1], 0  ;;  %s1011_s12 = smov 0   ;;  %s1013_s13 = smov 0  }
   0x2   :  { %s1015_s14 = smov 0   ;;  %s1017_s15 = smov 0  }
   0x3   :  { %s1019_s16 = smov 0   ;;  %s1021_s17 = smov 0  }
   0x4 LB: > { %s680_s18 = sadd.s32 4294967295, %s986_s17   ;;  %s681_s19 = sadd.s32 4294967294, %s986_s17   ;;  %s986_s17 = sphi %s1021_s17, %s16_s17   ;;  %s982_s16 = sphi %s1019_s16, %s1270_s16   ;;  %s978_s15 = sphi %s1017_s15, %s1269_s15   ;;  %s974_s14 = sphi %s1015_s14, %s1268_s14   ;;  %s970_s13 = sphi %s1013_s13, %s1267_s13   ;;  %s966_s12 = sphi %s1011_s12, %s1266_s12  }
   0x5   : > { %s28_s20 = sadd.s32 1, %s982_s16  ;;  %s115_s21 = sadd.s32 1, %s974_s14 }
   0x6   : > { %p30_p0 = scmp.ge.s32.totalorder %s28_s20, 4  ;;  %p125_p1 = scmp.ne.s32.totalorder %s974_s14, %s970_s13 }
   0x7   : > { %p126_p2 = scmp.eq.s32.totalorder %s680_s18, 3  ;;  %p131_p3 = scmp.ne.s32.totalorder %s970_s13, %s966_s12 }
   0x8   : > { %s1272_s20 = smov (%p30_p0, %s28_s20), 0  ;;  %p132_p5 = scmp.eq.s32.totalorder %s681_s19, 3 }
   0x9   : > { %p1051_p4 = por %p126_p2, %p125_p1  ;;  %s110_s23 = ssub.s32 %s982_s16, %s1272_s20 }
   0xa   : > { %p686_p6 = scmp.ge.s32.totalorder %s986_s17, 1  ;;  %p113_p7 = scmp.eq.s32.totalorder %s110_s23, 0 }
   0xb   : > { %p1058_p8 = por %p132_p5, %p131_p3  ;;  %p172_p9 = scmp.lt.s32.totalorder %s986_s17, 5 }
   0xc   : > { %s1064_s25 = scalar_select %p113_p7, %s974_s14, %s115_s21  }
   0xd   : > { %p173_p10 = pnand %p686_p6, %p172_p9 }
   0xe   : > { %s688_s30 = sshll.u32 (!%p173_p10), %s978_s15, 4  ;;  %s200_s21 = sand.u32 (!%p173_p10), 1, %s970_s13  }
   0xf   : > { %176 = sbr.rel (%p173_p10) target bundleno = 288 (0x120), region = 32  ;;  %p204_p11 = scmp.lt.s32.totalorder (!%p173_p10), %s688_s30, 63 }
  0x10   : > { %s687_s23 = sshll.u32 (!%p173_p10), %s200_s21, 7  ;;  %s728_s27 = sshll.u32 (!%p173_p10), %s978_s15, 11 }
  0x11   : > { %s1172_s26 = scalar_lea.vmem (!%p173_p10), [#allocation2], %s687_s23  ;;  %s1205_s15 = scalar_lea.hbm (!%p173_p10), %s1263_s3, %s728_s27 }
  0x12   : > { %s581_s28 = sshll.u32 (!%p173_p10), %s1172_s26, 4  ;;  %s1215_s4 = scalar_lea.sflag (!%p173_p10), [#allocation3], %s200_s21  ;;  %s1207_s28 = int_to_ptr.vmem [resolvable:$true] %s581_s28 }
  0x13   : > { %s910_s5 = scalar_lea.vmem (!%p173_p10), %s1207_s28, 2048  ;;  %s988_s6 = smov (!%p173_p10), [#allocation2]  }
  0x14   : > { %v236_v0 = vld [vmem:[%s1261_s1 + $0x18] sm:$0xff]  ;;  %v235_v1 = vld [vmem:[%s1261_s1 + $0x10] sm:$0xff]  ;;  %v234_v2 = vld [vmem:[%s1261_s1 + $0x8] sm:$0xff]  ;;  %s1274_s30 = smov (!%p204_p11, %s688_s30), 63  ;;  %vm244_vm0 = vcmask 261120   ;;  %p911_p12 = scmp.ne.s32.totalorder %s1207_s28, %s910_s5 }
  0x15   : > { %749 = vmatprep.subr.mxu0 %v236_v0  ;;  %781 = vmatprep.subr.mxu1 %v236_v0  ;;  %v233_v3 = vld [vmem:[%s1261_s1] sm:$0xff]  ;;  %s689_s8 = sshll.u32 %s1274_s30, 3  ;;  %s914_s7 = sshll.u32 %s988_s6, 4  ;;  %s915_s7 = int_to_ptr.vmem [resolvable:$false] %s914_s7 }
  0x16   : > { %750 = vmatpush3.msra.mxu0 %v236_v0  ;;  %785 = vmatpush3.msra.mxu1 %v236_v0  ;;  %s1082_s11 = scalar_lea.vmem %s1260_s0, %s689_s8  ;;  %v690_v20 = vld [vmem:[%s1262_s2] ss:$0 sm:$0xff]  ;;  %p912_p13 = pnand %p911_p12, %p1051_p4 }
  0x17   : > { %751 = vmatprep.subr.mxu0 %v235_v1  ;;  %782 = vmatprep.subr.mxu1 %v235_v1  ;;  %v217_v4 = vld [vmem:[%s1082_s11] sm:$0xff]  ;;  %v218_v6 = vld [vmem:[%s1082_s11 + $0x8] sm:$0xff]  ;;  %v219_v8 = vld [vmem:[%s1082_s11 + $0x10] sm:$0xff]  ;;  %s916_s8 = scalar_lea.vmem %s915_s7, 4096  ;;  %p917_p1 = scmp.lt.s32.totalorder %s1207_s28, %s915_s7 }
  0x18   : > { %752 = vmatpush3.msra.mxu0 %v235_v1  ;;  %786 = vmatpush3.msra.mxu1 %v235_v1  ;;  %v225_v5 = vld [vmem:[%s1082_s11 + $0x40] sm:$0xff]  ;;  %v226_v7 = vld [vmem:[%s1082_s11 + $0x48] sm:$0xff]  ;;  %v227_v9 = vld [vmem:[%s1082_s11 + $0x50] sm:$0xff]  ;;  %p913_p0 = pneg %p912_p13  ;;  %p918_p2 = scmp.lt.s32.totalorder %s916_s8, %s910_s5 }
  0x19   : > { %753 = vmatprep.subr.mxu0 %v234_v2  ;;  %783 = vmatprep.subr.mxu1 %v234_v2  ;;  %v220_v10 = vld [vmem:[%s1082_s11 + $0x18] sm:$0xff]  ;;  %v221_v12 = vld [vmem:[%s1082_s11 + $0x20] sm:$0xff]  ;;  %v222_v14 = vld [vmem:[%s1082_s11 + $0x28] sm:$0xff] }
  0x1a   : > { %754 = vmatpush3.msra.mxu0 %v234_v2  ;;  %787 = vmatpush3.msra.mxu1 %v234_v2  ;;  %v228_v11 = vld [vmem:[%s1082_s11 + $0x58] sm:$0xff]  ;;  %v229_v13 = vld [vmem:[%s1082_s11 + $0x60] sm:$0xff]  ;;  %v230_v15 = vld [vmem:[%s1082_s11 + $0x68] sm:$0xff]  ;;  %p919_p3 = por %p918_p2, %p917_p1 }
  0x1b   : > { %755 = vmatprep.subr.mxu0 %v233_v3  ;;  %784 = vmatprep.subr.mxu1 %v233_v3  ;;  %v223_v16 = vld [vmem:[%s1082_s11 + $0x30] sm:$0xff]  ;;  %v224_v18 = vld [vmem:[%s1082_s11 + $0x38] sm:$0xff] }
  0x1c   : > { %756 = vmatpush3.msra.mxu0 %v233_v3  ;;  %788 = vmatpush3.msra.mxu1 %v233_v3  ;;  %v231_v17 = vld [vmem:[%s1082_s11 + $0x70] sm:$0xff]  ;;  %v232_v19 = vld [vmem:[%s1082_s11 + $0x78] sm:$0xff]  ;;  %p920_p5 = pnand %p919_p3, %p913_p0 }
  0x1d   : > { %757 = vmatprep.mubr.msk.f32.mxu0 %vm244_vm0, %v217_v4  ;;  %769 = vmatprep.mubr.msk.f32.mxu1 %vm244_vm0, %v225_v5 }
  0x1e   : > { %758 = vmatmul.mubr.msk.f32.vlgmr.msra.gmra.mxu0 %vm244_vm0, %v218_v6  ;;  %770 = vmatmul.mubr.msk.f32.vlgmr.msra.gmra.mxu1 %vm244_vm0, %v226_v7 }
  0x1f   : > { %760 = vmatprep.mubr.msk.f32.mxu0 %vm244_vm0, %v219_v8  ;;  %772 = vmatprep.mubr.msk.f32.mxu1 %vm244_vm0, %v227_v9 }
  0x22   : > { %761 = vmatmul.mubr.msk.f32.gmra.mxu0 %vm244_vm0, %v220_v10  ;;  %773 = vmatmul.mubr.msk.f32.gmra.mxu1 %vm244_vm0, %v228_v11 }
  0x23   : > { %763 = vmatprep.mubr.msk.f32.mxu0 %vm244_vm0, %v221_v12  ;;  %775 = vmatprep.mubr.msk.f32.mxu1 %vm244_vm0, %v229_v13 }
  0x26   : > { %764 = vmatmul.mubr.msk.f32.gmra.mxu0 %vm244_vm0, %v222_v14  ;;  %776 = vmatmul.mubr.msk.f32.gmra.mxu1 %vm244_vm0, %v230_v15 }
  0x27   : > { %766 = vmatprep.mubr.msk.f32.mxu0 %vm244_vm0, %v223_v16  ;;  %778 = vmatprep.mubr.msk.f32.mxu1 %vm244_vm0, %v231_v17 }
  0x2a   : > { %767 = vmatmul.mubr.msk.f32.gmra.mxu0 %vm244_vm0, %v224_v18  ;;  %779 = vmatmul.mubr.msk.f32.gmra.mxu1 %vm244_vm0, %v232_v19 }
  0xde   : > { %v759_v21 = vpop.f32.mrf.mxu0  ;;  %v771_v22 = vpop.f32.mrf.mxu1 }
  0xdf   : > { %v1119_v23 = vadd.f32 %v759_v21, %v690_v20  ;;  %v1121_v24 = vadd.f32 %v771_v22, %v690_v20 }
  0xe0   : > { %v359_v25 = vpop.f32.mrf.mxu0  ;;  %v399_v26 = vpop.f32.mrf.mxu1 }
  0xe1   : > { %v708_v27 = vmul.f32 -1.442695, %v1119_v23  ;;  %v716_v28 = vmul.f32 -1.442695, %v1121_v24  ;;  %v1125_v29 = vadd.f32 %v690_v20, %v359_v25  ;;  %v1127_v30 = vadd.f32 %v690_v20, %v399_v26 }
  0xe2   : > { %v762_v31 = vpop.f32.mrf.mxu0  ;;  %v774_v32 = vpop.f32.mrf.mxu1 }
  0xe3   : > { %846 = vpow2.f32 %v708_v27  ;;  %v707_v33 = vmul.f32 -1.442695, %v1125_v29  ;;  %v715_v34 = vmul.f32 -1.442695, %v1127_v30  ;;  %v1131_v35 = vadd.f32 %v762_v31, %v690_v20 }
  0xe4   : > { %848 = vpow2.f32 %v716_v28  ;;  %v1133_v36 = vadd.f32 %v774_v32, %v690_v20  ;;  %v369_v37 = vpop.f32.mrf.mxu0  ;;  %v409_v38 = vpop.f32.mrf.mxu1 }
  0xe5   : > { %850 = vpow2.f32 %v707_v33  ;;  %v710_v39 = vmul.f32 -1.442695, %v1131_v35  ;;  %v1136_v40 = vadd.f32 %v690_v20, %v369_v37  ;;  %v1138_v41 = vadd.f32 %v690_v20, %v409_v38 }
  0xe6   : > { %852 = vpow2.f32 %v715_v34  ;;  %v718_v42 = vmul.f32 -1.442695, %v1133_v36  ;;  %v765_v43 = vpop.f32.mrf.mxu0  ;;  %v777_v44 = vpop.f32.mrf.mxu1 }
  0xe7   : > { %854 = vpow2.f32 %v710_v39  ;;  %v709_v45 = vmul.f32 -1.442695, %v1136_v40  ;;  %v717_v46 = vmul.f32 -1.442695, %v1138_v41  ;;  %v1143_v47 = vadd.f32 %v765_v43, %v690_v20 }
  0xe8   : > { %856 = vpow2.f32 %v718_v42  ;;  %v1145_v48 = vadd.f32 %v777_v44, %v690_v20  ;;  %v379_v49 = vpop.f32.mrf.mxu0  ;;  %v419_v50 = vpop.f32.mrf.mxu1 }
  0xe9   : > { %858 = vpow2.f32 %v709_v45  ;;  %v712_v51 = vmul.f32 -1.442695, %v1143_v47  ;;  %v1148_v52 = vadd.f32 %v690_v20, %v379_v49  ;;  %v1150_v53 = vadd.f32 %v690_v20, %v419_v50 }
  0xea   : > { %860 = vpow2.f32 %v717_v46  ;;  %v720_v54 = vmul.f32 -1.442695, %v1145_v48  ;;  %v768_v55 = vpop.f32.mrf.mxu0  ;;  %v780_v56 = vpop.f32.mrf.mxu1 }
  0xeb   : > { %862 = vpow2.f32 %v712_v51  ;;  %v711_v57 = vmul.f32 -1.442695, %v1148_v52  ;;  %v719_v58 = vmul.f32 -1.442695, %v1150_v53  ;;  %v1155_v59 = vadd.f32 %v768_v55, %v690_v20 }
  0xec   : > { %864 = vpow2.f32 %v720_v54  ;;  %v1157_v60 = vadd.f32 %v780_v56, %v690_v20  ;;  %v389_v61 = vpop.f32.mrf.mxu0  ;;  %v429_v62 = vpop.f32.mrf.mxu1 }
  0xed   : > { %866 = vpow2.f32 %v711_v57  ;;  %v714_v63 = vmul.f32 -1.442695, %v1155_v59  ;;  %v1160_v0 = vadd.f32 %v690_v20, %v389_v61  ;;  %v1162_v1 = vadd.f32 %v690_v20, %v429_v62 }
  0xee   : > { %868 = vpow2.f32 %v719_v58  ;;  %v722_v2 = vmul.f32 -1.442695, %v1157_v60 }
  0xef   : > { %870 = vpow2.f32 %v714_v63  ;;  %v713_v3 = vmul.f32 -1.442695, %v1160_v0  ;;  %v721_v4 = vmul.f32 -1.442695, %v1162_v1 }
  0xf0   : > { %v847_v5 = vpop.eup %846  ;;  %872 = vpow2.f32 %v722_v2 }
  0xf1   : > { %v849_v6 = vpop.eup %848  ;;  %v487_v7 = vadd.f32 1.0, %v847_v5  ;;  %874 = vpow2.f32 %v713_v3 }
  0xf2   : > { %v851_v8 = vpop.eup %850  ;;  %v495_v9 = vadd.f32 1.0, %v849_v6  ;;  %876 = vpow2.f32 %v721_v4 }
  0xf3   : > { %v853_v10 = vpop.eup %852  ;;  %878 = vrcp.f32 %v487_v7  ;;  %v486_v11 = vadd.f32 1.0, %v851_v8 }
  0xf4   : > { %v855_v12 = vpop.eup %854  ;;  %880 = vrcp.f32 %v495_v9  ;;  %v494_v13 = vadd.f32 1.0, %v853_v10 }
  0xf5   : > { %v857_v14 = vpop.eup %856  ;;  %882 = vrcp.f32 %v486_v11  ;;  %v489_v15 = vadd.f32 1.0, %v855_v12 }
  0xf6   : > { %v859_v16 = vpop.eup %858  ;;  %884 = vrcp.f32 %v494_v13  ;;  %v497_v17 = vadd.f32 1.0, %v857_v14 }
  0xf7   : > { %v861_v18 = vpop.eup %860  ;;  %886 = vrcp.f32 %v489_v15  ;;  %v488_v19 = vadd.f32 1.0, %v859_v16 }
  0xf8   : > { %v863_v20 = vpop.eup %862  ;;  %888 = vrcp.f32 %v497_v17  ;;  %v496_v21 = vadd.f32 1.0, %v861_v18 }
  0xf9   : > { %v865_v22 = vpop.eup %864  ;;  %890 = vrcp.f32 %v488_v19  ;;  %v491_v25 = vadd.f32 1.0, %v863_v20 }
  0xfa   : > { %v867_v26 = vpop.eup %866  ;;  %892 = vrcp.f32 %v496_v21  ;;  %v499_v27 = vadd.f32 1.0, %v865_v22 }
  0xfb   : > { %v869_v28 = vpop.eup %868  ;;  %894 = vrcp.f32 %v491_v25  ;;  %v490_v31 = vadd.f32 1.0, %v867_v26 }
  0xfc   : > { %v871_v32 = vpop.eup %870  ;;  %896 = vrcp.f32 %v499_v27  ;;  %v498_v33 = vadd.f32 1.0, %v869_v28 }
  0xfd   : > { %v873_v34 = vpop.eup %872  ;;  %898 = vrcp.f32 %v490_v31  ;;  %v493_v37 = vadd.f32 1.0, %v871_v32 }
  0xfe   : > { %v875_v38 = vpop.eup %874  ;;  %900 = vrcp.f32 %v498_v33  ;;  %v501_v39 = vadd.f32 1.0, %v873_v34 }
  0xff   : > { %v877_v42 = vpop.eup %876  ;;  %902 = vrcp.f32 %v493_v37  ;;  %v492_v43 = vadd.f32 1.0, %v875_v38 }
 0x100   : > { %v879_v44 = vpop.eup %878  ;;  %904 = vrcp.f32 %v501_v39  ;;  %v500_v45 = vadd.f32 1.0, %v877_v42 }
 0x101   : > { %v881_v46 = vpop.eup %880  ;;  %v535_v49 = vmul.f32 %v879_v44, %v1119_v23  ;;  %906 = vrcp.f32 %v492_v43 }
 0x102   : > { %v883_v50 = vpop.eup %882  ;;  %v543_v51 = vmul.f32 %v881_v46, %v1121_v24  ;;  %908 = vrcp.f32 %v500_v45 }
 0x103   : > { %v885_v54 = vpop.eup %884  ;;  %551 = vst [vmem:[%s1172_s26 + $0x8] sm:$0xff] %v535_v49  ;;  %v534_v55 = vmul.f32 %v883_v50, %v1125_v29 }
 0x104   : > { %v887_v56 = vpop.eup %886  ;;  %559 = vst [vmem:[%s1172_s26 + $0x48] sm:$0xff] %v543_v51  ;;  %v542_v23 = vmul.f32 %v885_v54, %v1127_v30 }
 0x105   : > { %v889_v57 = vpop.eup %888  ;;  %550 = vst [vmem:[%s1172_s26] sm:$0xff] %v534_v55  ;;  %v537_v24 = vmul.f32 %v887_v56, %v1131_v35 }
 0x106   : > { %v891_v58 = vpop.eup %890  ;;  %558 = vst [vmem:[%s1172_s26 + $0x40] sm:$0xff] %v542_v23  ;;  %v545_v61 = vmul.f32 %v889_v57, %v1133_v36 }
 0x107   : > { %v893_v62 = vpop.eup %892  ;;  %553 = vst [vmem:[%s1172_s26 + $0x18] sm:$0xff] %v537_v24  ;;  %v536_v29 = vmul.f32 %v891_v58, %v1136_v40 }
 0x108   : > { %v895_v63 = vpop.eup %894  ;;  %561 = vst [vmem:[%s1172_s26 + $0x58] sm:$0xff] %v545_v61  ;;  %v544_v30 = vmul.f32 %v893_v62, %v1138_v41 }
 0x109   : > { %v897_v2 = vpop.eup %896  ;;  %552 = vst [vmem:[%s1172_s26 + $0x10] sm:$0xff] %v536_v29  ;;  %v539_v35 = vmul.f32 %v895_v63, %v1143_v47 }
 0x10a   : > { %v899_v3 = vpop.eup %898  ;;  %560 = vst [vmem:[%s1172_s26 + $0x50] sm:$0xff] %v544_v30  ;;  %v547_v36 = vmul.f32 %v897_v2, %v1145_v48 }
 0x10b   : > { %v901_v4 = vpop.eup %900  ;;  %555 = vst [vmem:[%s1172_s26 + $0x28] sm:$0xff] %v539_v35  ;;  %v538_v40 = vmul.f32 %v899_v3, %v1148_v52 }
 0x10c   : > { %v903_v5 = vpop.eup %902  ;;  %563 = vst [vmem:[%s1172_s26 + $0x68] sm:$0xff] %v547_v36  ;;  %v546_v41 = vmul.f32 %v901_v4, %v1150_v53 }
 0x10d   : > { %v905_v47 = vpop.eup %904  ;;  %554 = vst [vmem:[%s1172_s26 + $0x20] sm:$0xff] %v538_v40  ;;  %v541_v6 = vmul.f32 %v903_v5, %v1155_v59 }
 0x10e   : > { %v907_v48 = vpop.eup %906  ;;  %562 = vst [vmem:[%s1172_s26 + $0x60] sm:$0xff] %v546_v41  ;;  %v549_v7 = vmul.f32 %v905_v47, %v1157_v60 }
 0x10f   : > { %v909_v52 = vpop.eup %908  ;;  %557 = vst [vmem:[%s1172_s26 + $0x38] sm:$0xff] %v541_v6  ;;  %v540_v8 = vmul.f32 %v907_v48, %v1160_v0 }
 0x110   : > { %565 = vst [vmem:[%s1172_s26 + $0x78] sm:$0xff] %v549_v7  ;;  %v548_v53 = vmul.f32 %v909_v52, %v1162_v1 }
 0x111   : > { %556 = vst [vmem:[%s1172_s26 + $0x30] sm:$0xff] %v540_v8 }
 0x112   : > { %564 = vst [vmem:[%s1172_s26 + $0x70] sm:$0xff] %v548_v53 }
 0x113   : > { %923 = shalt.err (!%p920_p5)
}
 0x114   : > { %s924_s9 = scalar_lea.hbm %s1205_s15, 2048  ;;  %s928_s18 = scalar_lea.hbm %s1263_s3, 8192 }
 0x115   : > { %p925_p6 = scmp.ne.s32.totalorder %s1205_s15, %s924_s9  ;;  %p929_p10 = scmp.lt.s32.totalorder %s1205_s15, %s1263_s3 }
 0x116   : > { %p930_p11 = scmp.lt.s32.totalorder %s928_s18, %s924_s9 }
 0x117   : > { %p926_p7 = pnand %p925_p6, %p1051_p4 }
 0x118   : > { %p931_p12 = por %p930_p11, %p929_p10 }
 0x119   : > { %p927_p9 = pneg %p926_p7 }
 0x11b   : > { %p932_p13 = pnand %p931_p12, %p927_p9 }
 0x11d   : > { %935 = shalt.err (!%p932_p13)
}
 0x11e   : > { %s989_s23 = smov 128   ;;  %s990_s26 = smov 8  }
 0x11f   : > { %789 = dma.vmem_to_hbm [thread:$0]  (%p1051_p4), %s1207_s28, 2048, %s1205_s15, %s1215_s4, %s989_s23, %s989_s23, %s990_s26  }
 0x120 PF: > { %p795_p0 = scmp.ge.s32.totalorder %s986_s17, 2  ;;  %s596_s27 = sand.u32 1, %s966_s12  }
 0x121   : > { %s597_s29 = scalar_lea.sflag [#allocation3], %s596_s27 }
 0x122   : > { %p792_p1 = pnand %p795_p0, %p1058_p8 }
 0x124   : > { %p793_p2 = pneg %p792_p1 }
 0x126   : > { %961 = dma.done.wait (%p793_p2), %s597_s29, 2048  }
 0x127   : > { %963 = vsyncadd (%p793_p2), %s597_s29, 4294965248  ;;  %s16_s17 = sadd.s32 1, %s986_s17   ;;  %s1266_s12 = smov %s970_s13 }
 0x128   : > { %p13_p3 = scmp.ge.s32.totalorder %s16_s17, 6   ;;  %s1267_s13 = smov %s974_s14 }
 0x129   : > { %s1268_s14 = smov %s1064_s25  ;;  %s1269_s15 = smov %s982_s16 }
 0x12a   : > { %s1270_s16 = smov %s1272_s20  ;;  %15 = sbr.rel (!%p13_p3) target bundleno = 4 (0x4), region = 73 }
 0x12f   :  { %602 = vsyncpa [#allocation3], 1 }
 0x130   :  { %604 = vsyncpa [#allocation3 + $0x1], 1 }

</bundles_post_ra>
